<compile_context>
chip_gen: v5e
topology: v5e:2x2
jax: 0.10.0
libtpu: 0.0.40
codegen_flags: <defaults>
</compile_context>

<pallas_src>
import functools

import jax
import jax.numpy as jnp
from jax.experimental import pallas as pl
from jax.experimental.pallas import tpu as pltpu


def _cosface_kernel(labels_ref, logits_ref, out_ref, *, s, m, tile_c):
    # grid axis 0: batch tile (outer), grid axis 1: class tile (inner)
    col_base = pl.program_id(1) * tile_c

    labels = labels_ref[...]                      # (tb, 1) int32
    x = logits_ref[...].astype(jnp.float32)       # (tb, tc)

    # Global class index for each element of this tile.  labels == -1 can
    # never match a column index (cols >= 0), so no extra validity mask.
    cols = jax.lax.broadcasted_iota(jnp.int32, x.shape, 1) + col_base
    is_target = cols == labels                    # broadcast (tb,1) vs (tb,tc)

    # FMA-shaped: x * s plus an additive -m*s only on the target column.
    delta = jnp.where(is_target, jnp.float32(-m * s), jnp.float32(0.0))
    out_ref[...] = (x * s + delta).astype(out_ref.dtype)


def cosface(logits, labels, s=64.0, m=0.4, *, tile_b=None, tile_c=None):
    """CosFace margin. logits: [B, C] float, labels: [B] int (-1 = ignore)."""
    B, C = logits.shape

    # Large, lane-dense default tiles, clamped to the array dims.  With f32
    # and double-buffered input + output blocks, VMEM ~= 4 * tb * tc * 4 B,
    # so 256 x 4096 stays around 16 MiB (safe for v7x's 32 MiB scoped VMEM).
    if tile_b is None:
        tile_b = B if B <= 256 else 256
    if tile_c is None:
        tile_c = C if C <= 4096 else 4096
    # (8, 128) layout rule: block dims must be multiples of (8, 128) or equal
    # the full array dims.
    if tile_b != B:
        tile_b = max(8, (tile_b // 8) * 8)
    if tile_c != C:
        tile_c = max(128, (tile_c // 128) * 128)

    labels2d = labels.reshape(B, 1).astype(jnp.int32)

    grid = (pl.cdiv(B, tile_b), pl.cdiv(C, tile_c))
    kernel = functools.partial(
        _cosface_kernel, s=float(s), m=float(m), tile_c=tile_c)

    return pl.pallas_call(
        kernel,
        out_shape=jax.ShapeDtypeStruct((B, C), logits.dtype),
        grid_spec=pltpu.PrefetchScalarGridSpec(
            num_scalar_prefetch=0,
            grid=grid,
            in_specs=[
                # labels block stays resident across the inner class axis (j).
                pl.BlockSpec((tile_b, 1), lambda i, j: (i, 0)),
                pl.BlockSpec((tile_b, tile_c), lambda i, j: (i, j)),
            ],
            out_specs=pl.BlockSpec((tile_b, tile_c), lambda i, j: (i, j)),
        ),
        compiler_params=pltpu.CompilerParams(
            dimension_semantics=("parallel", "parallel"),
        ),
    )(labels2d, logits)


def cosface_ref(logits, labels, s=64.0, m=0.4):
    B, C = logits.shape
    lab = labels.reshape(B, 1)
    onehot = (jax.lax.broadcasted_iota(jnp.int32, (B, C), 1) == lab) & (lab != -1)
    return jnp.where(onehot, logits - m, logits) * s


def _run_case(key, B, C, **tile_kwargs):
    k1, k2, k3 = jax.random.split(key, 3)
    logits = jax.random.normal(k1, (B, C), dtype=jnp.float32)
    labels = jax.random.randint(k2, (B,), 0, C, dtype=jnp.int32)
    # mark some rows as "ignored" (label == -1)
    labels = jnp.where(jax.random.bernoulli(k3, 0.25, (B,)), -1, labels)

    out = jax.block_until_ready(
        cosface(logits, labels, s=64.0, m=0.4, **tile_kwargs))
    ref = cosface_ref(logits, labels, s=64.0, m=0.4)
    assert out.shape == (B, C) and out.dtype == logits.dtype
    assert jnp.allclose(out, ref, atol=1e-4, rtol=1e-5), (B, C, tile_kwargs)


if __name__ == "__main__":
    key = jax.random.PRNGKey(0)
    keys = jax.random.split(key, 3)

    # Small case: single large tile covers the whole array.
    _run_case(keys[0], 8, 256)
    # Multi-tile grid along both axes (labels stay resident across j).
    _run_case(keys[1], 16, 512, tile_b=8, tile_c=128)
    # Ragged class dim: pl.cdiv grid, out-of-bounds writes discarded.
    _run_case(keys[2], 8, 200, tile_c=128)

    print("KERNEL_OK")
</pallas_src>

<mosaic_0001>
module attributes {stable_mosaic.version = 11 : i64} {
  func.func @_cosface_kernel(%arg0: i32, %arg1: i32, %arg2: memref<8x1xi32, #tpu.memory_space<vmem>>, %arg3: memref<8x256xf32, #tpu.memory_space<vmem>>, %arg4: memref<8x256xf32, #tpu.memory_space<vmem>>) attributes {dimension_semantics = [#tpu.dimension_semantics<parallel>, #tpu.dimension_semantics<parallel>], iteration_bounds = array<i64: 1, 1>, scalar_prefetch = 0 : i64, scratch_operands = 0 : i64, tpu.core_type = #tpu.core_type<tc>, window_params = [{transform_indices = @transform_0, window_bounds = array<i64: 8, 1>}, {transform_indices = @transform_1, window_bounds = array<i64: 8, 256>}, {transform_indices = @transform_2, window_bounds = array<i64: 8, 256>}]} {
    %c256_i32 = arith.constant 256 : i32
    %0 = arith.muli %arg1, %c256_i32 : i32
    %c0 = arith.constant 0 : index
    %c0_0 = arith.constant 0 : index
    %1 = vector.load %arg2[%c0, %c0_0] : memref<8x1xi32, #tpu.memory_space<vmem>>, vector<8x1xi32>
    %c0_1 = arith.constant 0 : index
    %c0_2 = arith.constant 0 : index
    %2 = vector.load %arg3[%c0_1, %c0_2] : memref<8x256xf32, #tpu.memory_space<vmem>>, vector<8x256xf32>
    %3 = tpu.iota {dimensions = array<i32: 1>} : vector<8x256xi32>
    %4 = vector.broadcast %0 : i32 to vector<8x256xi32>
    %5 = arith.addi %3, %4 : vector<8x256xi32>
    %6 = vector.broadcast %1 : vector<8x1xi32> to vector<8x256xi32>
    %7 = arith.cmpi eq, %5, %6 : vector<8x256xi32>
    %cst = arith.constant -2.560000e+01 : f32
    %cst_3 = arith.constant 0.000000e+00 : f32
    %8 = vector.broadcast %cst : f32 to vector<8x256xf32>
    %9 = vector.broadcast %cst_3 : f32 to vector<8x256xf32>
    %10 = arith.select %7, %8, %9 : vector<8x256xi1>, vector<8x256xf32>
    %cst_4 = arith.constant 6.400000e+01 : f32
    %11 = vector.broadcast %cst_4 : f32 to vector<8x256xf32>
    %12 = arith.mulf %2, %11 : vector<8x256xf32>
    %13 = arith.addf %12, %10 : vector<8x256xf32>
    %c0_5 = arith.constant 0 : index
    %c0_6 = arith.constant 0 : index
    %14 = vector.load %arg4[%c0_5, %c0_6] : memref<8x256xf32, #tpu.memory_space<vmem>>, vector<8x256xf32>
    tpu.vector_store %arg4[%c0_5, %c0_6], %13 {strides = array<i32>} : memref<8x256xf32, #tpu.memory_space<vmem>>, vector<8x256xf32>,
    return
  }
  func.func @transform_0(%arg0: i32, %arg1: i32) -> (i32, i32) {
    %c0_i32 = arith.constant 0 : i32
    %c0_i32_0 = arith.constant 0 : i32
    return %arg0, %c0_i32 : i32, i32
  }
  func.func @transform_1(%arg0: i32, %arg1: i32) -> (i32, i32) {
    %c0_i32 = arith.constant 0 : i32
    return %arg0, %arg1 : i32, i32
  }
  func.func @transform_2(%arg0: i32, %arg1: i32) -> (i32, i32) {
    %c0_i32 = arith.constant 0 : i32
    return %arg0, %arg1 : i32, i32
  }
}

</mosaic_0001>

<bundles_post_ra>
// kernel: tpu_custom_call.1
= control target key start
LH: loop header
LB: loop body
LE: loop exit
PB: predicated region body
PF: predicated region fallthrough
CT: control target
= control target key end

     0   :  { %7 = vsyncpa [#allocation3], 0  ;;  %s151_s0 = inlined_call_operand.vmem [shape: s32[8,1], index: 0, kind: input, shape index: {}]   ;;  %s152_s1 = inlined_call_operand.hbm [shape: f32[8,256], index: 1, kind: input, shape index: {}]   ;;  %s153_s2 = inlined_call_operand.hbm [shape: f32[8,256], index: 2, kind: output, shape index: {}]  }
   0x1   :  { %8 = vsyncpa [#allocation4], 0  ;;  %s16_s11 = sshll.u32 %s152_s1, 4  ;;  %s123_s12 = smov [#allocation2]   ;;  %s17_s11 = int_to_ptr.hbm [resolvable:$true] %s16_s11 }
   0x2   :  { %s18_s13 = sshll.u32 %s123_s12, 4  ;;  %s19_s13 = int_to_ptr.vmem [resolvable:$true] %s18_s13 }
   0x3   :  { %21 = dma.hbm_to_vmem [thread:$0]  %s17_s11, 256, %s19_s13, [#allocation3]  }
   0x4   :  { %119 = dma.done.wait [#allocation3], 256  }
   0x5   :  { %120 = vsyncadd [#allocation3], 4294967040  ;;  %v124_v0 = vmov 0   ;;  %v27_v1 = vld [vmem:[%s151_s0] sm:$0xff]  ;;  %v30_v2 = vlaneseq  ;;  %v29_v5 = vld [vmem:[#allocation2 + $0x8] sm:$0xff]  ;;  %s125_s1 = smov [#allocation5]  }
   0x6   :  { %70 = vset.pattern.permute.xlu0 %v124_v0  ;;  %v28_v4 = vld [vmem:[#allocation2] sm:$0xff]  ;;  %v44_v8 = vmul.f32 64.0, %v29_v5  ;;  %s54_s16 = sshll.u32 %s125_s1, 4  ;;  %s56_s19 = sshll.u32 %s153_s2, 4  ;;  %v126_v10 = vmov 0.0   ;;  %s55_s16 = int_to_ptr.vmem [resolvable:$true] %s54_s16  ;;  %s57_s19 = int_to_ptr.hbm [resolvable:$true] %s56_s19 }
   0x7   :  { %37 = vperm.xlu0 %70, %v27_v1   ;;  %v31_v3 = vand.u32 127, %v30_v2  ;;  %v43_v7 = vmul.f32 64.0, %v28_v4 }
   0x9   :  { %v32_v6 = vadd.s32 128, %v31_v3 }
  0x79   :  { %v38_v9 = vpop.permute.xlu0 %37 }
  0x7a   :  { %vm39_vm0 = vcmp.eq.s32.totalorder %v31_v3, %v38_v9  ;;  %vm40_vm1 = vcmp.eq.s32.totalorder %v32_v6, %v38_v9 }
  0x7b   :  { %v41_v11 = vsel %vm39_vm0, -25.6, %v126_v10  ;;  %v42_v12 = vsel %vm40_vm1, -25.6, %v126_v10 }
  0x7c   :  { %v45_v13 = vadd.f32 %v43_v7, %v41_v11  ;;  %v46_v14 = vadd.f32 %v44_v8, %v42_v12 }
  0x7e   :  { %47 = vst [vmem:[#allocation5] sm:$0xff] %v45_v13 }
  0x7f   :  { %48 = vst [vmem:[#allocation5 + $0x8] sm:$0xff] %v46_v14 }
  0x80   :  { %59 = dma.vmem_to_hbm [thread:$0]  %s55_s16, 256, %s57_s19, [#allocation4]  }
  0x81   :  { %121 = dma.done.wait [#allocation4], 256  }
  0x82   :  { %122 = vsyncadd [#allocation4], 4294967040 }
  0x83   :  { %64 = vsyncpa [#allocation3], 1 }
  0x84   :  { %65 = vsyncpa [#allocation4], 1 }

</bundles_post_ra>
